<compile_context>
chip_gen: v7x
topology: tpu7x:2x2x1
jax: 0.10.0
libtpu: 0.0.40
codegen_flags: <defaults>
</compile_context>

<pallas_src>
import functools
import math

import jax
import jax.numpy as jnp
from jax.experimental import pallas as pl
from jax.experimental.pallas import tpu as pltpu

_LN_EPS = 1e-5  # PyTorch nn.LayerNorm default


def _patch_merge_kernel(a_ref, b_ref, wa_ref, wb_ref, bias_ref, o_ref, *, c2, tpr):
    """One grid step: rt "super rows" of the image -> rt*wcols packed output rows.

    a_ref   : (rt, wcols, width)  even-H image rows; per token lanes hold [x0 | x2]
    b_ref   : (rt, wcols, width)  odd-H  image rows; per token lanes hold [x1 | x3]
    wa_ref  : (width, width)      gamma-folded reduction rows for the even-H half
    wb_ref  : (width, width)      gamma-folded reduction rows for the odd-H half
    bias_ref: (1, width)          beta @ weight.T   (tiled tpr times)
    o_ref   : (rt*wcols, width)
    where width = tpr * 2C (tpr merged tokens packed side by side per row).
    """
    assert tpr in (1, 2)
    rt, wcols, width = a_ref.shape
    rows = rt * wcols

    # Halves are read straight from their (squeezed) refs -- no 4-D block
    # intermediate.  The leading-dim merge is a free view when wcols is sublane
    # aligned; otherwise Mosaic inserts a relayout copy (rare, still correct).
    a = a_ref[...].reshape(rows, width).astype(jnp.float32)
    b = b_ref[...].reshape(rows, width).astype(jnp.float32)

    inv_4c = 1.0 / (2.0 * c2)  # 1 / (4 * dim)

    if tpr == 1:
        s = jnp.sum(a, axis=-1, keepdims=True) + jnp.sum(b, axis=-1, keepdims=True)
        mean = s * inv_4c                                        # (rows, 1)
        ac = a - mean
        bc = b - mean
        q = (jnp.sum(ac * ac, axis=-1, keepdims=True)
             + jnp.sum(bc * bc, axis=-1, keepdims=True))
        rstd = jax.lax.rsqrt(q * inv_4c + _LN_EPS)               # (rows, 1)
    else:
        # Two merged tokens per VMEM row (lanes [0,c2) and [c2,2*c2)): per-token
        # statistics via masked lane reductions.  rsqrt only on the (rows, 1)
        # per-token variances, then lane-selected (EUP work ~ 2*rows).
        lane = jax.lax.broadcasted_iota(jnp.int32, (rows, width), 1)
        left = lane < c2                                         # token slot 0
        s_all = (jnp.sum(a, axis=-1, keepdims=True)
                 + jnp.sum(b, axis=-1, keepdims=True))
        s0 = (jnp.sum(jnp.where(left, a, 0.0), axis=-1, keepdims=True)
              + jnp.sum(jnp.where(left, b, 0.0), axis=-1, keepdims=True))
        mean = jnp.where(left, s0, s_all - s0) * inv_4c          # per-lane mean
        ac = a - mean
        bc = b - mean
        aa = ac * ac
        bb = bc * bc
        q_all = (jnp.sum(aa, axis=-1, keepdims=True)
                 + jnp.sum(bb, axis=-1, keepdims=True))
        q0 = (jnp.sum(jnp.where(left, aa, 0.0), axis=-1, keepdims=True)
              + jnp.sum(jnp.where(left, bb, 0.0), axis=-1, keepdims=True))
        r0 = jax.lax.rsqrt(q0 * inv_4c + _LN_EPS)                # (rows, 1)
        r1 = jax.lax.rsqrt((q_all - q0) * inv_4c + _LN_EPS)      # (rows, 1)
        rstd = jnp.where(left, r0, r1)                           # (rows, width)

    wa = wa_ref[...]
    wb = wb_ref[...]
    if wa.dtype != jnp.float32:          # opt-in bf16 MXU path
        ac = ac.astype(wa.dtype)
        bc = bc.astype(wb.dtype)

    z = (jnp.dot(ac, wa, preferred_element_type=jnp.float32)
         + jnp.dot(bc, wb, preferred_element_type=jnp.float32))
    out = z * rstd + bias_ref[...].astype(jnp.float32)
    o_ref[...] = out.astype(o_ref.dtype)


def _block_diag2(m):
    z = jnp.zeros_like(m)
    top = jnp.concatenate([m, z], axis=1)
    bot = jnp.concatenate([z, m], axis=1)
    return jnp.concatenate([top, bot], axis=0)


def _vmem_capacity_bytes():
    try:
        return int(pltpu.get_tpu_info().vmem_capacity_bytes)
    except Exception:
        return 64 * 1024 * 1024      # conservative (v7x-sized) fallback


def _invariant_spec(block_shape, index_map):
    """BlockSpec for a grid-invariant operand; single-buffered when supported."""
    try:
        return pl.BlockSpec(block_shape, index_map, pipeline_mode=pl.Buffered(1))
    except (AttributeError, TypeError):
        return pl.BlockSpec(block_shape, index_map)


def _block_vmem_bytes(rt, wcols, width, x_itemsize, out_itemsize, w_itemsize):
    rows = rt * wcols
    in_blk = 2 * rt * wcols * width * x_itemsize        # even + odd halves
    out_blk = rows * width * out_itemsize
    wgt = 2 * width * width * w_itemsize + width * 4    # single-buffered weights + bias
    temps = 8 * rows * width * 4                         # f32 working set in the body
    return 2 * (in_blk + out_blk) + wgt + temps          # in/out double-buffered


def _choose_rt(R, wcols, width, x_itemsize, out_itemsize, w_itemsize,
               target_tokens, vmem_budget, sub_align):
    """Super rows per grid step.  The grid uses cdiv (ragged last block allowed),
    so rt only needs (rt*wcols) % sub_align == 0, not a divisor of R."""
    rows_align = sub_align // math.gcd(sub_align, wcols)
    per_rt = wcols * width * (4 * x_itemsize + 2 * out_itemsize + 8 * 4)
    const = 2 * width * width * w_itemsize + width * 4
    rt_vmem = (vmem_budget - const) // per_rt
    rt_tok = max(1, target_tokens // wcols)
    rt_steps = max(1, R // 4)        # >= ~4 grid steps (2 per v7x TensorCore)
    rt = min(rt_vmem, rt_tok, rt_steps, R)
    rt = (rt // rows_align) * rows_align
    if rt <= 0:
        # Smallest layout-legal tile; whole-array block only for tiny shapes.
        rt = rows_align if rows_align <= R else R
    return int(rt)


def patch_merging_2d(x, gamma, beta, weight, *, use_bf16_matmul=False,
                     out_dtype=None, target_tokens=1024, vmem_budget_bytes=None):
    """Fused PatchMerging2D forward.

    x      : (B, H, W, C)   channels-last, like the PyTorch module
    gamma  : (4C,)          LayerNorm weight
    beta   : (4C,)          LayerNorm bias
    weight : (2C, 4C)       nn.Linear(4*dim, 2*dim, bias=False).weight
    returns: (B, H//2, W//2, 2C)

    use_bf16_matmul: opt-in bf16 MXU path (deviates slightly from f32 reference).
    out_dtype      : optional narrower output dtype (e.g. bf16 consumer).
    """
    B, H, W, C = x.shape
    Hh, Wh = H // 2, W // 2
    if H % 2 or W % 2:
        # PyTorch SHAPE_FIX branch: drop the trailing odd row / column.
        # TODO(synk): the PyTorch module also prints a warning here; not emitted.
        x = x[:, :2 * Hh, :2 * Wh, :]
    C2, C4 = 2 * C, 4 * C
    out_dtype = x.dtype if out_dtype is None else jnp.dtype(out_dtype)
    if Hh == 0 or Wh == 0:
        return jnp.zeros((B, Hh, Wh, C2), dtype=out_dtype)

    R = B * Hh                       # one "super row" per output H row
    N = R * Wh                       # number of merged tokens

    # --- trace-time folding: gamma -> matmul rows, beta -> output bias ---
    wt = weight.astype(jnp.float32).T                             # (4C, 2C)
    bias = (beta.astype(jnp.float32) @ wt).reshape(1, C2)
    wt = wt * gamma.astype(jnp.float32)[:, None]
    # even-H image rows carry [x0 | x2]; odd-H image rows carry [x1 | x3]
    w_a = jnp.concatenate([wt[0:C], wt[2 * C:3 * C]], axis=0)     # (2C, 2C)
    w_b = jnp.concatenate([wt[C:2 * C], wt[3 * C:4 * C]], axis=0)

    # --- lane-dense packing for small dims: tpr tokens side by side per row ---
    tpr = 2 if (C2 < 128 and Wh % 2 == 0) else 1
    if tpr == 2:
        w_a = _block_diag2(w_a)                                   # (4C, 4C)
        w_b = _block_diag2(w_b)
        bias = jnp.concatenate([bias, bias], axis=-1)             # (1, 4C)
    w_dtype = jnp.bfloat16 if use_bf16_matmul else jnp.float32
    w_a = w_a.astype(w_dtype)
    w_b = w_b.astype(w_dtype)

    wcols = Wh // tpr
    width = tpr * C2

    # --- free contiguous-regroup view; the 2x2 gather happens inside the kernel ---
    xq = x.reshape(R, 2, wcols, width)

    # --- generation-aware VMEM budget / limit ---
    vmem_cap = _vmem_capacity_bytes()                             # 64 MiB v7x, 128 MiB v5e/v6e
    limit_ceiling = max(32 * 1024 * 1024, vmem_cap - 8 * 1024 * 1024)
    if vmem_budget_bytes is None:
        vmem_budget_bytes = min(56 * 1024 * 1024, (3 * vmem_cap) // 4)

    sub_align = {4: 8, 2: 16, 1: 32}.get(out_dtype.itemsize, 8)
    rt = _choose_rt(R, wcols, width, x.dtype.itemsize, out_dtype.itemsize,
                    jnp.dtype(w_dtype).itemsize, target_tokens, vmem_budget_bytes,
                    sub_align)
    grid = pl.cdiv(R, rt)            # ragged last block handled by Pallas OOB masking
    rows = rt * wcols

    vmem_need = _block_vmem_bytes(rt, wcols, width, x.dtype.itemsize,
                                  out_dtype.itemsize, jnp.dtype(w_dtype).itemsize)
    vmem_limit = int(max(32 * 1024 * 1024,
                         min(limit_ceiling, (5 * vmem_need) // 4)))

    kernel = functools.partial(_patch_merge_kernel, c2=C2, tpr=tpr)

    out_packed = pl.pallas_call(
        kernel,
        out_shape=jax.ShapeDtypeStruct((R * wcols, width), out_dtype),
        grid_spec=pltpu.PrefetchScalarGridSpec(
            num_scalar_prefetch=0,
            grid=(grid,),
            in_specs=[
                # Same HBM array passed twice; squeezed parity dim gives the
                # kernel clean (rt, wcols, width) refs for each half.
                pl.BlockSpec((rt, None, wcols, width), lambda i: (i, 0, 0, 0)),
                pl.BlockSpec((rt, None, wcols, width), lambda i: (i, 1, 0, 0)),
                # Grid-invariant operands: fetched once, single-buffered.
                _invariant_spec((width, width), lambda i: (0, 0)),
                _invariant_spec((width, width), lambda i: (0, 0)),
                _invariant_spec((1, width), lambda i: (0, 0)),
            ],
            out_specs=pl.BlockSpec((rows, width), lambda i: (i, 0)),
        ),
        compiler_params=pltpu.CompilerParams(
            dimension_semantics=("parallel",),
            vmem_limit_bytes=vmem_limit,
        ),
        cost_estimate=pl.CostEstimate(
            flops=int(2 * N * C4 * C2),              # useful flops only
            transcendentals=int(N),
            bytes_accessed=int(N * C4 * x.dtype.itemsize
                               + N * C2 * out_dtype.itemsize
                               + 2 * width * width * jnp.dtype(w_dtype).itemsize),
        ),
    )(xq, xq, w_a, w_b, bias)

    # free reshapes back to the module's output layout
    return out_packed.reshape(B, Hh, Wh, C2)


def _reference(x, gamma, beta, weight):
    """Pure-JAX mirror of the PyTorch PatchMerging2D.forward."""
    B, H, W, C = x.shape
    Hh, Wh = H // 2, W // 2
    x = x[:, :2 * Hh, :2 * Wh, :]
    x0 = x[:, 0::2, 0::2, :]
    x1 = x[:, 1::2, 0::2, :]
    x2 = x[:, 0::2, 1::2, :]
    x3 = x[:, 1::2, 1::2, :]
    xc = jnp.concatenate([x0, x1, x2, x3], axis=-1)
    mean = jnp.mean(xc, axis=-1, keepdims=True)
    var = jnp.mean((xc - mean) ** 2, axis=-1, keepdims=True)
    y = (xc - mean) / jnp.sqrt(var + _LN_EPS) * gamma + beta
    return jnp.einsum("bhwc,oc->bhwo", y, weight)


if __name__ == "__main__":
    key = jax.random.PRNGKey(0)
    fwd = jax.jit(patch_merging_2d)

    cases = [
        (2, 16, 32, 32),   # tpr=2 lane packing, even 4-step grid
        (2, 8, 16, 64),    # tpr=1 (2C = 128), multi-step grid
        (3, 6, 32, 16),    # ragged grid (last block partially out of bounds)
        (2, 9, 33, 48),    # odd H / W -> SHAPE_FIX crop branch
    ]
    for (B, H, W, C) in cases:
        kx, kg, kb, kw, key = jax.random.split(key, 5)
        x = jax.random.normal(kx, (B, H, W, C), dtype=jnp.float32)
        gamma = 1.0 + 0.1 * jax.random.normal(kg, (4 * C,), dtype=jnp.float32)
        beta = 0.1 * jax.random.normal(kb, (4 * C,), dtype=jnp.float32)
        weight = (jax.random.normal(kw, (2 * C, 4 * C), dtype=jnp.float32)
                  / jnp.sqrt(4.0 * C))        # nn.Linear(4C, 2C, bias=False).weight

        out = jax.block_until_ready(fwd(x, gamma, beta, weight))
        ref = _reference(x, gamma, beta, weight)
        assert out.shape == (B, H // 2, W // 2, 2 * C), (out.shape, (B, H, W, C))
        err = float(jnp.max(jnp.abs(out - ref)))
        assert jnp.allclose(out, ref, atol=1e-3, rtol=1e-3), \
            f"case {(B, H, W, C)}: max abs err {err}"

    print("KERNEL_OK")
</pallas_src>

<mosaic_0001>
module attributes {stable_mosaic.version = 11 : i64} {
  func.func @_patch_merge_kernel(%arg0: i32, %arg1: memref<4x1x8x128xf32, #tpu.memory_space<vmem>>, %arg2: memref<4x1x8x128xf32, #tpu.memory_space<vmem>>, %arg3: memref<128x128xf32, #tpu.memory_space<vmem>>, %arg4: memref<128x128xf32, #tpu.memory_space<vmem>>, %arg5: memref<1x128xf32, #tpu.memory_space<vmem>>, %arg6: memref<32x128xf32, #tpu.memory_space<vmem>>) attributes {dimension_semantics = [#tpu.dimension_semantics<parallel>], iteration_bounds = array<i64: 4>, scalar_prefetch = 0 : i64, scratch_operands = 0 : i64, tpu.core_type = #tpu.core_type<tc>, window_params = [{transform_indices = @transform_0, window_bounds = array<i64: 4, 1, 8, 128>}, {transform_indices = @transform_1, window_bounds = array<i64: 4, 1, 8, 128>}, {pipeline_mode = #tpu.pipeline_mode<synchronous>, transform_indices = @transform_2, window_bounds = array<i64: 128, 128>}, {pipeline_mode = #tpu.pipeline_mode<synchronous>, transform_indices = @transform_3, window_bounds = array<i64: 128, 128>}, {pipeline_mode = #tpu.pipeline_mode<synchronous>, transform_indices = @transform_4, window_bounds = array<i64: 1, 128>}, {transform_indices = @transform_5, window_bounds = array<i64: 32, 128>}]} {
    %c0 = arith.constant 0 : index
    %c0_0 = arith.constant 0 : index
    %c0_1 = arith.constant 0 : index
    %c0_2 = arith.constant 0 : index
    %0 = vector.load %arg1[%c0, %c0_0, %c0_1, %c0_2] : memref<4x1x8x128xf32, #tpu.memory_space<vmem>>, vector<4x1x8x128xf32>
    %1 = vector.shape_cast %0 : vector<4x1x8x128xf32> to vector<4x8x128xf32>
    %2 = vector.shape_cast %1 : vector<4x8x128xf32> to vector<32x128xf32>
    %c0_3 = arith.constant 0 : index
    %c0_4 = arith.constant 0 : index
    %c0_5 = arith.constant 0 : index
    %c0_6 = arith.constant 0 : index
    %3 = vector.load %arg2[%c0_3, %c0_4, %c0_5, %c0_6] : memref<4x1x8x128xf32, #tpu.memory_space<vmem>>, vector<4x1x8x128xf32>
    %4 = vector.shape_cast %3 : vector<4x1x8x128xf32> to vector<4x8x128xf32>
    %5 = vector.shape_cast %4 : vector<4x8x128xf32> to vector<32x128xf32>
    %6 = tpu.iota {dimensions = array<i32: 1>} : vector<32x128xi32>
    %c64_i32 = arith.constant 64 : i32
    %7 = vector.broadcast %c64_i32 : i32 to vector<32x128xi32>
    %8 = arith.cmpi slt, %6, %7 : vector<32x128xi32>
    %cst = arith.constant dense<0.000000e+00> : vector<32xf32>
    %9 = vector.multi_reduction <add>, %2, %cst [1] : vector<32x128xf32> to vector<32xf32>
    %10 = vector.shape_cast %9 : vector<32xf32> to vector<32x1xf32>
    %cst_7 = arith.constant dense<0.000000e+00> : vector<32xf32>
    %11 = vector.multi_reduction <add>, %5, %cst_7 [1] : vector<32x128xf32> to vector<32xf32>
    %12 = vector.shape_cast %11 : vector<32xf32> to vector<32x1xf32>
    %13 = arith.addf %10, %12 : vector<32x1xf32>
    %cst_8 = arith.constant 0.000000e+00 : f32
    %14 = vector.broadcast %cst_8 : f32 to vector<32x128xf32>
    %15 = arith.select %8, %2, %14 : vector<32x128xi1>, vector<32x128xf32>
    %cst_9 = arith.constant dense<0.000000e+00> : vector<32xf32>
    %16 = vector.multi_reduction <add>, %15, %cst_9 [1] : vector<32x128xf32> to vector<32xf32>
    %17 = vector.shape_cast %16 : vector<32xf32> to vector<32x1xf32>
    %cst_10 = arith.constant 0.000000e+00 : f32
    %18 = vector.broadcast %cst_10 : f32 to vector<32x128xf32>
    %19 = arith.select %8, %5, %18 : vector<32x128xi1>, vector<32x128xf32>
    %cst_11 = arith.constant dense<0.000000e+00> : vector<32xf32>
    %20 = vector.multi_reduction <add>, %19, %cst_11 [1] : vector<32x128xf32> to vector<32xf32>
    %21 = vector.shape_cast %20 : vector<32xf32> to vector<32x1xf32>
    %22 = arith.addf %17, %21 : vector<32x1xf32>
    %23 = arith.subf %13, %22 : vector<32x1xf32>
    %24 = vector.shape_cast %22 : vector<32x1xf32> to vector<32x1xf32>
    %25 = vector.broadcast %24 : vector<32x1xf32> to vector<32x128xf32>
    %26 = vector.shape_cast %23 : vector<32x1xf32> to vector<32x1xf32>
    %27 = vector.broadcast %26 : vector<32x1xf32> to vector<32x128xf32>
    %28 = arith.select %8, %25, %27 : vector<32x128xi1>, vector<32x128xf32>
    %cst_12 = arith.constant 7.812500e-03 : f32
    %29 = vector.broadcast %cst_12 : f32 to vector<32x128xf32>
    %30 = arith.mulf %28, %29 : vector<32x128xf32>
    %31 = arith.subf %2, %30 : vector<32x128xf32>
    %32 = arith.subf %5, %30 : vector<32x128xf32>
    %33 = arith.mulf %31, %31 : vector<32x128xf32>
    %34 = arith.mulf %32, %32 : vector<32x128xf32>
    %cst_13 = arith.constant dense<0.000000e+00> : vector<32xf32>
    %35 = vector.multi_reduction <add>, %33, %cst_13 [1] : vector<32x128xf32> to vector<32xf32>
    %36 = vector.shape_cast %35 : vector<32xf32> to vector<32x1xf32>
    %cst_14 = arith.constant dense<0.000000e+00> : vector<32xf32>
    %37 = vector.multi_reduction <add>, %34, %cst_14 [1] : vector<32x128xf32> to vector<32xf32>
    %38 = vector.shape_cast %37 : vector<32xf32> to vector<32x1xf32>
    %39 = arith.addf %36, %38 : vector<32x1xf32>
    %cst_15 = arith.constant 0.000000e+00 : f32
    %40 = vector.broadcast %cst_15 : f32 to vector<32x128xf32>
    %41 = arith.select %8, %33, %40 : vector<32x128xi1>, vector<32x128xf32>
    %cst_16 = arith.constant dense<0.000000e+00> : vector<32xf32>
    %42 = vector.multi_reduction <add>, %41, %cst_16 [1] : vector<32x128xf32> to vector<32xf32>
    %43 = vector.shape_cast %42 : vector<32xf32> to vector<32x1xf32>
    %cst_17 = arith.constant 0.000000e+00 : f32
    %44 = vector.broadcast %cst_17 : f32 to vector<32x128xf32>
    %45 = arith.select %8, %34, %44 : vector<32x128xi1>, vector<32x128xf32>
    %cst_18 = arith.constant dense<0.000000e+00> : vector<32xf32>
    %46 = vector.multi_reduction <add>, %45, %cst_18 [1] : vector<32x128xf32> to vector<32xf32>
    %47 = vector.shape_cast %46 : vector<32xf32> to vector<32x1xf32>
    %48 = arith.addf %43, %47 : vector<32x1xf32>
    %cst_19 = arith.constant 7.812500e-03 : f32
    %49 = vector.broadcast %cst_19 : f32 to vector<32x1xf32>
    %50 = arith.mulf %48, %49 : vector<32x1xf32>
    %cst_20 = arith.constant 9.99999974E-6 : f32
    %51 = vector.broadcast %cst_20 : f32 to vector<32x1xf32>
    %52 = arith.addf %50, %51 : vector<32x1xf32>
    %53 = math.rsqrt %52 : vector<32x1xf32>
    %54 = arith.subf %39, %48 : vector<32x1xf32>
    %cst_21 = arith.constant 7.812500e-03 : f32
    %55 = vector.broadcast %cst_21 : f32 to vector<32x1xf32>
    %56 = arith.mulf %54, %55 : vector<32x1xf32>
    %cst_22 = arith.constant 9.99999974E-6 : f32
    %57 = vector.broadcast %cst_22 : f32 to vector<32x1xf32>
    %58 = arith.addf %56, %57 : vector<32x1xf32>
    %59 = math.rsqrt %58 : vector<32x1xf32>
    %60 = vector.shape_cast %53 : vector<32x1xf32> to vector<32x1xf32>
    %61 = vector.broadcast %60 : vector<32x1xf32> to vector<32x128xf32>
    %62 = vector.shape_cast %59 : vector<32x1xf32> to vector<32x1xf32>
    %63 = vector.broadcast %62 : vector<32x1xf32> to vector<32x128xf32>
    %64 = arith.select %8, %61, %63 : vector<32x128xi1>, vector<32x128xf32>
    %c0_23 = arith.constant 0 : index
    %c0_24 = arith.constant 0 : index
    %65 = vector.load %arg3[%c0_23, %c0_24] : memref<128x128xf32, #tpu.memory_space<vmem>>, vector<128x128xf32>
    %c0_25 = arith.constant 0 : index
    %c0_26 = arith.constant 0 : index
    %66 = vector.load %arg4[%c0_25, %c0_26] : memref<128x128xf32, #tpu.memory_space<vmem>>, vector<128x128xf32>
    %cst_27 = arith.constant dense<0.000000e+00> : vector<32x128xf32>
    %67 = tpu.matmul %31, %65, %cst_27 {dimension_numbers = #tpu.dot_dimension_numbers<[1], [0], [0], [1], [0, 0, 1, 1], [], []>} : vector<32x128xf32>, vector<128x128xf32>, vector<32x128xf32> -> vector<32x128xf32>
    %cst_28 = arith.constant dense<0.000000e+00> : vector<32x128xf32>
    %68 = tpu.matmul %32, %66, %cst_28 {dimension_numbers = #tpu.dot_dimension_numbers<[1], [0], [0], [1], [0, 0, 1, 1], [], []>} : vector<32x128xf32>, vector<128x128xf32>, vector<32x128xf32> -> vector<32x128xf32>
    %69 = arith.addf %67, %68 : vector<32x128xf32>
    %70 = arith.mulf %69, %64 : vector<32x128xf32>
    %c0_29 = arith.constant 0 : index
    %c0_30 = arith.constant 0 : index
    %71 = vector.load %arg5[%c0_29, %c0_30] : memref<1x128xf32, #tpu.memory_space<vmem>>, vector<1x128xf32>
    %72 = vector.broadcast %71 : vector<1x128xf32> to vector<32x128xf32>
    %73 = arith.addf %70, %72 : vector<32x128xf32>
    %c0_31 = arith.constant 0 : index
    %c0_32 = arith.constant 0 : index
    %74 = vector.load %arg6[%c0_31, %c0_32] : memref<32x128xf32, #tpu.memory_space<vmem>>, vector<32x128xf32>
    tpu.vector_store %arg6[%c0_31, %c0_32], %73 {strides = array<i32>} : memref<32x128xf32, #tpu.memory_space<vmem>>, vector<32x128xf32>,
    return
  }
  func.func @transform_0(%arg0: i32) -> (i32, i32, i32, i32) {
    %c0_i32 = arith.constant 0 : i32
    %c0_i32_0 = arith.constant 0 : i32
    %c0_i32_1 = arith.constant 0 : i32
    %c0_i32_2 = arith.constant 0 : i32
    return %arg0, %c0_i32, %c0_i32_0, %c0_i32_1 : i32, i32, i32, i32
  }
  func.func @transform_1(%arg0: i32) -> (i32, i32, i32, i32) {
    %c1_i32 = arith.constant 1 : i32
    %c0_i32 = arith.constant 0 : i32
    %c0_i32_0 = arith.constant 0 : i32
    %c0_i32_1 = arith.constant 0 : i32
    return %arg0, %c1_i32, %c0_i32, %c0_i32_0 : i32, i32, i32, i32
  }
  func.func @transform_2(%arg0: i32) -> (i32, i32) {
    %c0_i32 = arith.constant 0 : i32
    %c0_i32_0 = arith.constant 0 : i32
    %c0_i32_1 = arith.constant 0 : i32
    return %c0_i32, %c0_i32_0 : i32, i32
  }
  func.func @transform_3(%arg0: i32) -> (i32, i32) {
    %c0_i32 = arith.constant 0 : i32
    %c0_i32_0 = arith.constant 0 : i32
    %c0_i32_1 = arith.constant 0 : i32
    return %c0_i32, %c0_i32_0 : i32, i32
  }
  func.func @transform_4(%arg0: i32) -> (i32, i32) {
    %c0_i32 = arith.constant 0 : i32
    %c0_i32_0 = arith.constant 0 : i32
    %c0_i32_1 = arith.constant 0 : i32
    return %c0_i32, %c0_i32_0 : i32, i32
  }
  func.func @transform_5(%arg0: i32) -> (i32, i32) {
    %c0_i32 = arith.constant 0 : i32
    %c0_i32_0 = arith.constant 0 : i32
    return %arg0, %c0_i32 : i32, i32
  }
}

</mosaic_0001>

<bundles_post_ra>
// kernel: patch_merging_2d.1
= control target key start
LH: loop header
LB: loop body
LE: loop exit
PB: predicated region body
PF: predicated region fallthrough
CT: control target
= control target key end

     0   :  { %s1119_s18 = smov 0   ;;  %s1121_s19 = smov 0   ;;  %s1386_s0 = inlined_call_operand.vmem [shape: f32[16,2,8,128], index: 0, kind: input, shape index: {}, may-alias: {0,1}]   ;;  %s1387_s1 = inlined_call_operand.vmem [shape: f32[16,2,8,128], index: 1, kind: input, shape index: {}, may-alias: {0,1}]   ;;  %s1388_s2 = inlined_call_operand.vmem [shape: f32[128,128], index: 2, kind: input, shape index: {}]   ;;  %s1389_s3 = inlined_call_operand.vmem [shape: f32[128,128], index: 3, kind: input, shape index: {}]   ;;  %s1390_s4 = inlined_call_operand.vmem [shape: f32[1,128], index: 4, kind: input, shape index: {}]   ;;  %s1391_s5 = inlined_call_operand.vmem [shape: f32[128,128], index: 5, kind: output, shape index: {}]  }
   0x1   :  { %s1123_s20 = smov 0  }
   0x2 LB: > { %s815_s21 = sadd.s32 4294967295, %s1087_s20   ;;  %s1136_s22 = sadd.s32 1, %s1087_s20   ;;  %s1087_s20 = sphi %s1123_s20, %s1395_s20   ;;  %s1083_s19 = sphi %s1121_s19, %s1394_s19   ;;  %s1079_s18 = sphi %s1119_s18, %s1393_s18  }
   0x3   : > { %s19_s23 = ssub.s32 %s1087_s20, %s1136_s22  ;;  %s22_s24 = sadd.s32 1, %s1083_s19 }
   0x4   : > { %p20_p0 = scmp.eq.s32.totalorder %s19_s23, 0  ;;  %p29_p1 = scmp.ne.s32.totalorder %s1083_s19, %s1079_s18 }
   0x5   : > { %p30_p2 = scmp.eq.s32.totalorder %s1087_s20, 0  ;;  %p818_p4 = scmp.ge.s32.totalorder %s1087_s20, 4 }
   0x6   : > { %s1145_s25 = scalar_select %p20_p0, %s1083_s19, %s22_s24  }
   0x7   : > { %p1147_p3 = por %p30_p2, %p29_p1  ;;  %179 = sbr.rel (%p818_p4) target bundleno = 28 (0x1c), region = 28 }
   0xe   : > { %182 = sbr.rel (!%p1147_p3) target bundleno = 21 (0x15), region = 32  ;;  %s184_s27 = sand.u32 (%p1147_p3), 1, %s1083_s19  }
   0xf   : > { %s839_s28 = sshll.u32 (%p1147_p3), %s1087_s20, 6  ;;  %s819_s29 = sshll.u32 (%p1147_p3), %s184_s27, 5 }
  0x10   : > { %s190_s7 = scalar_lea.vmem (%p1147_p3), %s1386_s0, %s839_s28  ;;  %s186_s8 = scalar_lea.vmem (%p1147_p3), [#allocation2], %s819_s29 }
  0x11   : > { %v224_v0 = vld [vmem:[%s190_s7] sm:$0xff] (%p1147_p3)  ;;  %v226_v1 = vld [vmem:[%s190_s7 + $0x10] sm:$0xff] (%p1147_p3) }
  0x12   : > { %v228_v2 = vld [vmem:[%s190_s7 + $0x20] sm:$0xff] (%p1147_p3)  ;;  %225 = vst [vmem:[%s186_s8] sm:$0xff] (%p1147_p3), %v224_v0  ;;  %227 = vst [vmem:[%s186_s8 + $0x8] sm:$0xff] (%p1147_p3), %v226_v1  ;;  %v230_v3 = vld [vmem:[%s190_s7 + $0x30] sm:$0xff] (%p1147_p3) }
  0x13   : > { %229 = vst [vmem:[%s186_s8 + $0x10] sm:$0xff] (%p1147_p3), %v228_v2  ;;  %231 = vst [vmem:[%s186_s8 + $0x18] sm:$0xff] (%p1147_p3), %v230_v3 }
  0x15 PF: > { %237 = sbr.rel (!%p1147_p3) target bundleno = 28 (0x1c), region = 70  ;;  %s239_s9 = sand.u32 (%p1147_p3), 1, %s1083_s19  }
  0x16   : > { %s840_s10 = sshll.u32 (%p1147_p3), %s1087_s20, 6  ;;  %s823_s11 = sshll.u32 (%p1147_p3), %s239_s9, 5 }
  0x17   : > { %s763_s14 = scalar_lea.vmem (%p1147_p3), %s1387_s1, %s840_s10  ;;  %s241_s15 = scalar_lea.vmem (%p1147_p3), [#allocation3], %s823_s11 }
  0x18   : > { %v826_v4 = vld [vmem:[%s763_s14 + $0x8] sm:$0xff] (%p1147_p3)  ;;  %v827_v5 = vld [vmem:[%s763_s14 + $0x18] sm:$0xff] (%p1147_p3) }
  0x19   : > { %v828_v6 = vld [vmem:[%s763_s14 + $0x28] sm:$0xff] (%p1147_p3)  ;;  %281 = vst [vmem:[%s241_s15] sm:$0xff] (%p1147_p3), %v826_v4  ;;  %283 = vst [vmem:[%s241_s15 + $0x8] sm:$0xff] (%p1147_p3), %v827_v5  ;;  %v829_v7 = vld [vmem:[%s763_s14 + $0x38] sm:$0xff] (%p1147_p3) }
  0x1a   : > { %285 = vst [vmem:[%s241_s15 + $0x10] sm:$0xff] (%p1147_p3), %v828_v6  ;;  %287 = vst [vmem:[%s241_s15 + $0x18] sm:$0xff] (%p1147_p3), %v829_v7 }
  0x1c PF: > { %p830_p5 = scmp.ge.s32.totalorder %s1087_s20, 1  ;;  %p292_p6 = scmp.lt.s32.totalorder %s1087_s20, 5 }
  0x1e   : > { %p293_p7 = pnand %p830_p5, %p292_p6 }
  0x1f   : > { %s299_s16 = sand.u32 (!%p293_p7), 1, %s1079_s18   ;;  %v353_v8 = vlaneseq (!%p293_p7)  ;;  %v528_v9 = vld [vmem:[%s1389_s3] sm:$0xff] (!%p293_p7)  ;;  %v529_v10 = vld [vmem:[%s1389_s3 + $0x8] sm:$0xff] (!%p293_p7)  ;;  %v530_v14 = vld [vmem:[%s1389_s3 + $0x10] sm:$0xff] (!%p293_p7)  ;;  %s833_s18 = sshll.u32 (!%p293_p7), %s815_s21, 2 }
  0x20   : > { %296 = sbr.rel (%p293_p7) target bundleno = 436 (0x1b4), region = 108  ;;  %v512_v11 = vld [vmem:[%s1388_s2] sm:$0xff] (!%p293_p7)  ;;  %s831_s29 = sshll.u32 (!%p293_p7), %s299_s16, 5  ;;  %v957_v12 = vpack.c.bf16 (!%p293_p7), %v529_v10, %v528_v9  ;;  %v513_v13 = vld [vmem:[%s1388_s2 + $0x8] sm:$0xff] (!%p293_p7)  ;;  %v531_v15 = vld [vmem:[%s1389_s3 + $0x18] sm:$0xff] (!%p293_p7) }
  0x21   : > { %v1187_v16 = vand.u32 (!%p293_p7), 127, %v353_v8  ;;  %v989_v17 = vpack.c.bf16 (!%p293_p7), %v513_v13, %v512_v11  ;;  %v961_v18 = vpack.c.bf16 (!%p293_p7), %v531_v15, %v530_v14  ;;  %v514_v19 = vld [vmem:[%s1388_s2 + $0x10] sm:$0xff] (!%p293_p7)  ;;  %v515_v20 = vld [vmem:[%s1388_s2 + $0x18] sm:$0xff] (!%p293_p7)  ;;  %s1195_s14 = scalar_lea.vmem (!%p293_p7), [#allocation2], %s831_s29  ;;  %s1202_s15 = scalar_lea.vmem (!%p293_p7), [#allocation3], %s831_s29  ;;  %v532_v24 = vld [vmem:[%s1389_s3 + $0x20] sm:$0xff] (!%p293_p7) }
  0x22   : > { %v1198_v21 = vld [vmem:[%s1195_s14] sm:$0xff] (!%p293_p7)  ;;  %958 = vmatprep.subr.bf16.mxu1 (!%p293_p7), %v957_v12  ;;  %v993_v22 = vpack.c.bf16 (!%p293_p7), %v515_v20, %v514_v19  ;;  %v533_v26 = vld [vmem:[%s1389_s3 + $0x28] sm:$0xff] (!%p293_p7)  ;;  %v1241_v36 = vld [vmem:[%s1195_s14 + $0x10] sm:$0xff] (!%p293_p7)  ;;  %p340_p8 = scmp.lt.s32.totalorder (!%p293_p7), %s833_s18, 15 }
  0x23   : > { %356 = vadd.xlane.f32.xlu0 (!%p293_p7), %v1198_v21  ;;  %vm355_vm0 = vcmp.lt.s32.totalorder (!%p293_p7), %v1187_v16, 64  ;;  %v1205_v23 = vld [vmem:[%s1202_s15] sm:$0xff] (!%p293_p7)  ;;  %990 = vmatprep.subr.bf16.mxu0 (!%p293_p7), %v989_v17  ;;  %v965_v29 = vpack.c.bf16 (!%p293_p7), %v533_v26, %v532_v24  ;;  %v517_v30 = vld [vmem:[%s1388_s2 + $0x28] sm:$0xff] (!%p293_p7)  ;;  %v534_v37 = vld [vmem:[%s1389_s3 + $0x30] sm:$0xff] (!%p293_p7) }
  0x24   : > { %v376_v25 = vsel (!%p293_p7), %vm355_vm0, %v1198_v21, 0.0  ;;  %960 = vmatpush3.bf16.msra.mxu1 (!%p293_p7), %v957_v12  ;;  %992 = vmatpush3.bf16.msra.mxu0 (!%p293_p7), %v989_v17  ;;  %v516_v27 = vld [vmem:[%s1388_s2 + $0x20] sm:$0xff] (!%p293_p7)  ;;  %v388_v28 = vsel (!%p293_p7), %vm355_vm0, %v1205_v23, 0.0  ;;  %v1227_v32 = vld [vmem:[%s1195_s14 + $0x8] sm:$0xff] (!%p293_p7)  ;;  %v535_v38 = vld [vmem:[%s1389_s3 + $0x38] sm:$0xff] (!%p293_p7)  ;;  %v378_v44 = vsel (!%p293_p7), %vm355_vm0, %v1241_v36, 0.0 }
  0x25   : > { %380 = vadd.xlane.f32.xlu1 (!%p293_p7), %v376_v25  ;;  %962 = vmatprep.subr.bf16.mxu1 (!%p293_p7), %v961_v18  ;;  %v997_v31 = vpack.c.bf16 (!%p293_p7), %v517_v30, %v516_v27  ;;  %v1230_v33 = vld [vmem:[%s1202_s15 + $0x8] sm:$0xff] (!%p293_p7)  ;;  %v377_v34 = vsel (!%p293_p7), %vm355_vm0, %v1227_v32, 0.0  ;;  %v518_v39 = vld [vmem:[%s1388_s2 + $0x30] sm:$0xff] (!%p293_p7)  ;;  %v969_v41 = vpack.c.bf16 (!%p293_p7), %v535_v38, %v534_v37  ;;  %v519_v42 = vld [vmem:[%s1388_s2 + $0x38] sm:$0xff] (!%p293_p7) }
  0x26   : > { %994 = vmatprep.subr.bf16.mxu0 (!%p293_p7), %v993_v22  ;;  %v389_v35 = vsel (!%p293_p7), %vm355_vm0, %v1230_v33, 0.0  ;;  %v1253_v40 = vld [vmem:[%s1202_s15 + $0x10] sm:$0xff] (!%p293_p7)  ;;  %v1001_v43 = vpack.c.bf16 (!%p293_p7), %v519_v42, %v518_v39  ;;  %v536_v45 = vld [vmem:[%s1389_s3 + $0x40] sm:$0xff] (!%p293_p7)  ;;  %v537_v46 = vld [vmem:[%s1389_s3 + $0x48] sm:$0xff] (!%p293_p7) }
  0x27   : > { %364 = vadd.xlane.f32.xlu0 %v1205_v23  ;;  %v520_v47 = vld [vmem:[%s1388_s2 + $0x40] sm:$0xff]  ;;  %v390_v48 = vsel %vm355_vm0, %v1253_v40, 0.0  ;;  %v973_v49 = vpack.c.bf16 %v537_v46, %v536_v45  ;;  %v521_v50 = vld [vmem:[%s1388_s2 + $0x48] sm:$0xff]  ;;  %v1279_v52 = vld [vmem:[%s1195_s14 + $0x18] sm:$0xff]  ;;  %s1397_s18 = smov (!%p340_p8, %s833_s18), 15 }
  0x28   : > { %964 = vmatpush3.bf16.msra.mxu1 %v961_v18  ;;  %996 = vmatpush3.bf16.msra.mxu0 %v993_v22  ;;  %v1005_v51 = vpack.c.bf16 %v521_v50, %v520_v47  ;;  %v538_v53 = vld [vmem:[%s1389_s3 + $0x50] sm:$0xff]  ;;  %v539_v54 = vld [vmem:[%s1389_s3 + $0x58] sm:$0xff]  ;;  %v379_v60 = vsel %vm355_vm0, %v1279_v52, 0.0  ;;  %v540_v61 = vld [vmem:[%s1389_s3 + $0x60] sm:$0xff]  ;;  %s834_s20 = sshll.u32 %s1397_s18, 3 }
  0x29   : > { %392 = vadd.xlane.f32.xlu1 %v388_v28  ;;  %966 = vmatprep.subr.bf16.mxu1 %v965_v29  ;;  %v522_v55 = vld [vmem:[%s1388_s2 + $0x50] sm:$0xff]  ;;  %v1291_v56 = vld [vmem:[%s1202_s15 + $0x18] sm:$0xff]  ;;  %v977_v57 = vpack.c.bf16 %v539_v54, %v538_v53  ;;  %v541_v62 = vld [vmem:[%s1389_s3 + $0x68] sm:$0xff]  ;;  %s343_s15 = scalar_lea.vmem %s1391_s5, %s834_s20 }
  0x2a   : > { %998 = vmatprep.subr.bf16.mxu0 %v997_v31  ;;  %v523_v58 = vld [vmem:[%s1388_s2 + $0x58] sm:$0xff]  ;;  %v524_v63 = vld [vmem:[%s1388_s2 + $0x60] sm:$0xff]  ;;  %v391_v0 = vsel %vm355_vm0, %v1291_v56, 0.0  ;;  %v981_v1 = vpack.c.bf16 %v541_v62, %v540_v61  ;;  %v525_v2 = vld [vmem:[%s1388_s2 + $0x68] sm:$0xff] }
  0x2b   : > { %358 = vadd.xlane.f32.xlu0 %v1227_v32  ;;  %v1009_v59 = vpack.c.bf16 %v523_v58, %v522_v55  ;;  %v1013_v3 = vpack.c.bf16 %v525_v2, %v524_v63  ;;  %v542_v4 = vld [vmem:[%s1389_s3 + $0x70] sm:$0xff]  ;;  %v543_v5 = vld [vmem:[%s1389_s3 + $0x78] sm:$0xff] }
  0x2c   : > { %968 = vmatpush3.bf16.msra.mxu1 %v965_v29  ;;  %1000 = vmatpush3.bf16.msra.mxu0 %v997_v31  ;;  %v526_v6 = vld [vmem:[%s1388_s2 + $0x70] sm:$0xff]  ;;  %v985_v7 = vpack.c.bf16 %v543_v5, %v542_v4  ;;  %v527_v8 = vld [vmem:[%s1388_s2 + $0x78] sm:$0xff] }
  0x2d   : > { %366 = vadd.xlane.f32.xlu1 %v1230_v33  ;;  %970 = vmatprep.subr.bf16.mxu1 %v969_v41  ;;  %v1017_v9 = vpack.c.bf16 %v527_v8, %v526_v6 }
  0x2e   : > { %1002 = vmatprep.subr.bf16.mxu0 %v1001_v43 }
  0x2f   : > { %382 = vadd.xlane.f32.xlu0 %v377_v34 }
  0x30   : > { %972 = vmatpush3.bf16.msra.mxu1 %v969_v41  ;;  %1004 = vmatpush3.bf16.msra.mxu0 %v1001_v43 }
  0x31   : > { %394 = vadd.xlane.f32.xlu1 %v389_v35  ;;  %974 = vmatprep.subr.bf16.mxu1 %v973_v49 }
  0x32   : > { %1006 = vmatprep.subr.bf16.mxu0 %v1005_v51 }
  0x33   : > { %360 = vadd.xlane.f32.xlu0 %v1241_v36 }
  0x34   : > { %976 = vmatpush3.bf16.msra.mxu1 %v973_v49  ;;  %1008 = vmatpush3.bf16.msra.mxu0 %v1005_v51 }
  0x35   : > { %368 = vadd.xlane.f32.xlu1 %v1253_v40  ;;  %978 = vmatprep.subr.bf16.mxu1 %v977_v57 }
  0x36   : > { %1010 = vmatprep.subr.bf16.mxu0 %v1009_v59 }
  0x37   : > { %384 = vadd.xlane.f32.xlu0 %v378_v44 }
  0x38   : > { %980 = vmatpush3.bf16.msra.mxu1 %v977_v57  ;;  %1012 = vmatpush3.bf16.msra.mxu0 %v1009_v59 }
  0x39   : > { %396 = vadd.xlane.f32.xlu1 %v390_v48  ;;  %982 = vmatprep.subr.bf16.mxu1 %v981_v1 }
  0x3a   : > { %1014 = vmatprep.subr.bf16.mxu0 %v1013_v3 }
  0x3b   : > { %362 = vadd.xlane.f32.xlu0 %v1279_v52 }
  0x3c   : > { %984 = vmatpush3.bf16.msra.mxu1 %v981_v1  ;;  %1016 = vmatpush3.bf16.msra.mxu0 %v1013_v3 }
  0x3d   : > { %370 = vadd.xlane.f32.xlu1 %v1291_v56  ;;  %986 = vmatprep.subr.bf16.mxu1 %v985_v7 }
  0x3e   : > { %1018 = vmatprep.subr.bf16.mxu0 %v1017_v9 }
  0x3f   : > { %386 = vadd.xlane.f32.xlu0 %v379_v60 }
  0x40   : > { %988 = vmatpush3.bf16.msra.mxu1 %v985_v7  ;;  %1020 = vmatpush3.bf16.msra.mxu0 %v1017_v9 }
  0x41   : > { %398 = vadd.xlane.f32.xlu1 %v391_v0 }
  0xb0   : > { %v357_v10 = vpop.xlane.xlu0 %356 }
  0xb2   : > { %v381_v11 = vpop.xlane.xlu1 %380 }
  0xb4   : > { %v365_v12 = vpop.xlane.xlu0 %364 }
  0xb5   : > { %v372_v14 = vadd.f32 %v365_v12, %v357_v10 }
  0xb6   : > { %v393_v13 = vpop.xlane.xlu1 %392 }
  0xb7   : > { %v400_v15 = vadd.f32 %v393_v13, %v381_v11 }
  0xb8   : > { %v359_v17 = vpop.xlane.xlu0 %358 }
  0xb9   : > { %v404_v18 = vsub.f32 %v372_v14, %v400_v15 }
  0xba   : > { %v367_v19 = vpop.xlane.xlu1 %366 }
  0xbb   : > { %v408_v20 = vsel %vm355_vm0, %v400_v15, %v404_v18  ;;  %v373_v28 = vadd.f32 %v367_v19, %v359_v17 }
  0xbc   : > { %v383_v22 = vpop.xlane.xlu0 %382  ;;  %v412_v24 = vmul.f32 0.0078125, %v408_v20 }
  0xbe   : > { %v395_v25 = vpop.xlane.xlu1 %394  ;;  %v420_v26 = vsub.f32 %v1205_v23, %v412_v24  ;;  %v416_v27 = vsub.f32 %v1198_v21, %v412_v24 }
  0xbf   : > { %v401_v29 = vadd.f32 %v395_v25, %v383_v22 }
  0xc0   : > { %913 = vmatprep.mubr.f32.mxu1 %v420_v26  ;;  %951 = vmatprep.mubr.f32.mxu0 %v416_v27  ;;  %v361_v30 = vpop.xlane.xlu0 %360  ;;  %v424_v31 = vmul.f32 %v416_v27, %v416_v27  ;;  %v428_v60 = vmul.f32 %v420_v26, %v420_v26 }
  0xc1   : > { %v405_v34 = vsub.f32 %v373_v28, %v401_v29 }
  0xc2   : > { %432 = vadd.xlane.f32.xlu0 %v424_v31  ;;  %v369_v35 = vpop.xlane.xlu1 %368  ;;  %v452_v0 = vsel %vm355_vm0, %v424_v31, 0.0 }
  0xc3   : > { %v409_v37 = vsel %vm355_vm0, %v401_v29, %v405_v34  ;;  %v374_v21 = vadd.f32 %v369_v35, %v361_v30 }
  0xc4   : > { %v413_v38 = vmul.f32 0.0078125, %v409_v37  ;;  %v385_v39 = vpop.xlane.xlu0 %384 }
  0xc6   : > { %v397_v41 = vpop.xlane.xlu1 %396  ;;  %v421_v42 = vsub.f32 %v1230_v33, %v413_v38  ;;  %v417_v23 = vsub.f32 %v1227_v32, %v413_v38 }
  0xc7   : > { %v402_v43 = vadd.f32 %v397_v41, %v385_v39 }
  0xc8   : > { %914 = vmatmul.mubr.f32.vlgmr.msra.gmra.mrb[0].mxu1 %v421_v42  ;;  %952 = vmatmul.mubr.f32.vlgmr.msra.gmra.mrb[0].mxu0 %v417_v23  ;;  %v363_v44 = vpop.xlane.xlu0 %362  ;;  %v425_v45 = vmul.f32 %v417_v23, %v417_v23  ;;  %v429_v63 = vmul.f32 %v421_v42, %v421_v42 }
  0xc9   : > { %v406_v46 = vsub.f32 %v374_v21, %v402_v43 }
  0xca   : > { %434 = vadd.xlane.f32.xlu1 %v425_v45  ;;  %v371_v47 = vpop.xlane.xlu1 %370  ;;  %v465_v5 = vsel %vm355_vm0, %v429_v63, 0.0 }
  0xcb   : > { %v410_v48 = vsel %vm355_vm0, %v402_v43, %v406_v46  ;;  %v375_v32 = vadd.f32 %v371_v47, %v363_v44 }
  0xcc   : > { %v414_v49 = vmul.f32 0.0078125, %v410_v48  ;;  %v387_v50 = vpop.xlane.xlu0 %386 }
  0xce   : > { %v399_v51 = vpop.xlane.xlu1 %398  ;;  %v422_v53 = vsub.f32 %v1253_v40, %v414_v49  ;;  %v418_v33 = vsub.f32 %v1241_v36, %v414_v49 }
  0xcf   : > { %v403_v54 = vadd.f32 %v399_v51, %v387_v50 }
  0xd0   : > { %916 = vmatprep.mubr.f32.mxu1 %v422_v53  ;;  %954 = vmatprep.mubr.f32.mxu0 %v418_v33  ;;  %v426_v55 = vmul.f32 %v418_v33, %v418_v33  ;;  %v430_v36 = vmul.f32 %v422_v53, %v422_v53 }
  0xd1   : > { %v407_v57 = vsub.f32 %v375_v32, %v403_v54 }
  0xd2   : > { %436 = vadd.xlane.f32.xlu0 %v426_v55  ;;  %v454_v2 = vsel %vm355_vm0, %v426_v55, 0.0  ;;  %v466_v3 = vsel %vm355_vm0, %v430_v36, 0.0 }
  0xd3   : > { %v411_v58 = vsel %vm355_vm0, %v403_v54, %v407_v57 }
  0xd4   : > { %v415_v59 = vmul.f32 0.0078125, %v411_v58 }
  0xd6   : > { %440 = vadd.xlane.f32.xlu0 %v428_v60  ;;  %v423_v61 = vsub.f32 %v1291_v56, %v415_v59  ;;  %v419_v62 = vsub.f32 %v1279_v52, %v415_v59  ;;  %v464_v52 = vsel %vm355_vm0, %v428_v60, 0.0  ;;  %v453_v56 = vsel %vm355_vm0, %v425_v45, 0.0 }
  0xd8   : > { %917 = vmatmul.mubr.f32.gmra.mrb[2].mxu1 %v423_v61  ;;  %955 = vmatmul.mubr.f32.gmra.mrb[2].mxu0 %v419_v62  ;;  %v427_v40 = vmul.f32 %v419_v62, %v419_v62  ;;  %v431_v1 = vmul.f32 %v423_v61, %v423_v61 }
  0xda   : > { %444 = vadd.xlane.f32.xlu0 %v430_v36  ;;  %438 = vadd.xlane.f32.xlu1 %v427_v40  ;;  %v455_v4 = vsel %vm355_vm0, %v427_v40, 0.0  ;;  %v467_v6 = vsel %vm355_vm0, %v431_v1, 0.0  ;;  %v835_v40 = vld [vmem:[%s1390_s4] ss:$0 sm:$0xff] }
  0xde   : > { %456 = vadd.xlane.f32.xlu0 %v452_v0  ;;  %442 = vadd.xlane.f32.xlu1 %v429_v63 }
  0xe2   : > { %460 = vadd.xlane.f32.xlu0 %v454_v2  ;;  %446 = vadd.xlane.f32.xlu1 %v431_v1 }
  0xe6   : > { %468 = vadd.xlane.f32.xlu0 %v464_v52  ;;  %458 = vadd.xlane.f32.xlu1 %v453_v56 }
  0xea   : > { %472 = vadd.xlane.f32.xlu0 %v466_v3  ;;  %462 = vadd.xlane.f32.xlu1 %v455_v4 }
  0xee   : > { %470 = vadd.xlane.f32.xlu1 %v465_v5 }
  0xf2   : > { %474 = vadd.xlane.f32.xlu1 %v467_v6 }
 0x14f   : > { %v433_v7 = vpop.xlane.xlu0 %432 }
 0x157   : > { %v435_v9 = vpop.xlane.xlu1 %434 }
 0x15f   : > { %v437_v8 = vpop.xlane.xlu0 %436 }
 0x163   : > { %v441_v10 = vpop.xlane.xlu0 %440 }
 0x164   : > { %v448_v27 = vadd.f32 %v441_v10, %v433_v7 }
 0x167   : > { %v439_v11 = vpop.xlane.xlu1 %438  ;;  %v445_v13 = vpop.xlane.xlu0 %444 }
 0x168   : > { %v450_v45 = vadd.f32 %v445_v13, %v437_v8 }
 0x16b   : > { %v443_v12 = vpop.xlane.xlu1 %442  ;;  %v457_v15 = vpop.xlane.xlu0 %456 }
 0x16c   : > { %v449_v26 = vadd.f32 %v443_v12, %v435_v9 }
 0x16f   : > { %v447_v14 = vpop.xlane.xlu1 %446  ;;  %v461_v19 = vpop.xlane.xlu0 %460 }
 0x170   : > { %v451_v44 = vadd.f32 %v447_v14, %v439_v11 }
 0x173   : > { %v459_v17 = vpop.xlane.xlu1 %458  ;;  %v469_v22 = vpop.xlane.xlu0 %468 }
 0x174   : > { %v476_v25 = vadd.f32 %v469_v22, %v457_v15 }
 0x176   : > { %v492_v29 = vsub.f32 %v448_v27, %v476_v25  ;;  %v480_v35 = vmul.f32 0.0078125, %v476_v25 }
 0x177   : > { %v463_v18 = vpop.xlane.xlu1 %462  ;;  %v473_v41 = vpop.xlane.xlu0 %472 }
 0x178   : > { %v496_v31 = vmul.f32 0.0078125, %v492_v29  ;;  %v484_v23 = vadd.f32 1e-05, %v480_v35  ;;  %v478_v43 = vadd.f32 %v473_v41, %v461_v19 }
 0x17a   : > { %v500_v38 = vadd.f32 1e-05, %v496_v31  ;;  %v494_v47 = vsub.f32 %v450_v45, %v478_v43  ;;  %v482_v33 = vmul.f32 0.0078125, %v478_v43 }
 0x17b   : > { %v471_v20 = vpop.xlane.xlu1 %470 }
 0x17c   : > { %v477_v24 = vadd.f32 %v471_v20, %v459_v17  ;;  %v498_v49 = vmul.f32 0.0078125, %v494_v47  ;;  %v486_v52 = vadd.f32 1e-05, %v482_v33 }
 0x17e   : > { %v493_v28 = vsub.f32 %v449_v26, %v477_v24  ;;  %v481_v34 = vmul.f32 0.0078125, %v477_v24  ;;  %v502_v62 = vadd.f32 1e-05, %v498_v49 }
 0x17f   : > { %v475_v39 = vpop.xlane.xlu1 %474 }
 0x180   : > { %v497_v30 = vmul.f32 0.0078125, %v493_v28  ;;  %v485_v42 = vadd.f32 1e-05, %v481_v34  ;;  %v479_v21 = vadd.f32 %v475_v39, %v463_v18 }
 0x182   : > { %v501_v37 = vadd.f32 1e-05, %v497_v30  ;;  %v495_v46 = vsub.f32 %v451_v44, %v479_v21  ;;  %v483_v51 = vmul.f32 0.0078125, %v479_v21 }
 0x184   : > { %1049 = vrsqrt.f32 %v501_v37  ;;  %v499_v48 = vmul.f32 0.0078125, %v495_v46  ;;  %v487_v0 = vadd.f32 1e-05, %v483_v51 }
 0x185   : > { %1051 = vrsqrt.f32 %v500_v38 }
 0x186   : > { %1053 = vrsqrt.f32 %v485_v42  ;;  %v503_v57 = vadd.f32 1e-05, %v499_v48 }
 0x187   : > { %1055 = vrsqrt.f32 %v484_v23 }
 0x188   : > { %1057 = vrsqrt.f32 %v503_v57 }
 0x189   : > { %1059 = vrsqrt.f32 %v502_v62 }
 0x18a   : > { %1061 = vrsqrt.f32 %v487_v0 }
 0x18b   : > { %1063 = vrsqrt.f32 %v486_v52 }
 0x18e   : > { %v1050_v50 = vpop.eup %1049 }
 0x18f   : > { %v1052_v53 = vpop.eup %1051 }
 0x190   : > { %v1054_v55 = vpop.eup %1053 }
 0x191   : > { %v1056_v61 = vpop.eup %1055  ;;  %v509_v36 = vsel %vm355_vm0, %v1054_v55, %v1050_v50 }
 0x192   : > { %v508_v2 = vsel %vm355_vm0, %v1056_v61, %v1052_v53  ;;  %v1058_v5 = vpop.eup %1057 }
 0x193   : > { %v1060_v6 = vpop.eup %1059 }
 0x194   : > { %v1062_v9 = vpop.eup %1061 }
 0x195   : > { %v1064_v13 = vpop.eup %1063  ;;  %v511_v14 = vsel %vm355_vm0, %v1062_v9, %v1058_v5 }
 0x196   : > { %v510_v18 = vsel %vm355_vm0, %v1064_v13, %v1060_v6 }
 0x19b   : > { %v915_v32 = vpop.f32.mrb[0].mxu1  ;;  %v953_v54 = vpop.f32.mrb[0].mxu0 }
 0x19c   : > { %v701_v58 = vadd.f32 %v953_v54, %v915_v32  ;;  %v610_v59 = vpop.f32.mrb[1].mxu1  ;;  %v695_v60 = vpop.f32.mrb[1].mxu0 }
 0x19d   : > { %v696_v63 = vadd.f32 %v695_v60, %v610_v59 }
 0x19e   : > { %v715_v1 = vmul.f32 %v701_v58, %v509_v36 }
 0x19f   : > { %v714_v56 = vmul.f32 %v696_v63, %v508_v2 }
 0x1a0   : > { %v726_v3 = vadd.f32 %v835_v40, %v715_v1 }
 0x1a1   : > { %v725_v4 = vadd.f32 %v835_v40, %v714_v56 }
 0x1a2   : > { %730 = vst [vmem:[%s343_s15 + $0x8] sm:$0xff] %v726_v3 }
 0x1a3   : > { %729 = vst [vmem:[%s343_s15] sm:$0xff] %v725_v4 }
 0x1ab   : > { %v918_v7 = vpop.f32.mrb[2].mxu1  ;;  %v956_v8 = vpop.f32.mrb[2].mxu0 }
 0x1ac   : > { %v711_v10 = vadd.f32 %v956_v8, %v918_v7  ;;  %v620_v11 = vpop.f32.mrb[3].mxu1  ;;  %v705_v12 = vpop.f32.mrb[3].mxu0 }
 0x1ad   : > { %v706_v15 = vadd.f32 %v705_v12, %v620_v11 }
 0x1ae   : > { %v717_v17 = vmul.f32 %v711_v10, %v511_v14 }
 0x1af   : > { %v716_v19 = vmul.f32 %v706_v15, %v510_v18 }
 0x1b0   : > { %v728_v20 = vadd.f32 %v835_v40, %v717_v17 }
 0x1b1   : > { %v727_v22 = vadd.f32 %v835_v40, %v716_v19 }
 0x1b2   : > { %732 = vst [vmem:[%s343_s15 + $0x18] sm:$0xff] %v728_v20 }
 0x1b3   : > { %731 = vst [vmem:[%s343_s15 + $0x10] sm:$0xff] %v727_v22 }
 0x1b4 PF: > { %p12_p9 = scmp.ge.s32.totalorder %s1136_s22, 6   ;;  %s1393_s18 = smov %s1083_s19 }
 0x1b5   : > { %s1394_s19 = smov %s1145_s25  ;;  %s1395_s20 = smov %s1136_s22 }
 0x1b6   :  { %14 = sbr.rel (!%p12_p9) target bundleno = 2 (0x2), region = 159 }

</bundles_post_ra>
